<compile_context>
chip_gen: v7x
topology: tpu7x:2x2x1
jax: 0.10.0
libtpu: 0.0.40
codegen_flags: <defaults>
</compile_context>

<pallas_src>
import jax
import jax.numpy as jnp
from jax.experimental import pallas as pl
from jax.experimental.pallas import tpu as pltpu


_LANE = 128
_ROW_ALIGN = 32            # rows; 32x128 elems covers f32 / bf16 / int8 packing
_MAX_TILE_ROWS = 8192      # 8192*128 = 1M elems per channel tile (4 MiB f32)
_VMEM_LIMIT_BYTES = 32 * 1024 * 1024


def _round_up(a, b):
    return ((a + b - 1) // b) * b


def _skel_recall_kernel(x_ref, y_ref, inter_ref, sumgt_ref, inter_acc, gt_acc):
    # x_ref:     (1, 1, T, 128)   one foreground channel's spatial tile (native dtype)
    # y_ref:     (1, 1, T, 128)   int8/int32 labels (same tile, reused across c)
    # inter_ref: (1, 1, 1, n_fg)  per-(batch, split) partial output
    # sumgt_ref: (1, 1, 1, n_fg)  per-(batch, split) partial output
    # inter_acc: (n_fg, 1, 128)   lane-parallel f32 scratch accumulators
    # gt_acc:    (n_fg, 1, 128)
    s = pl.program_id(2)          # spatial tile within this split (reduction)
    c = pl.program_id(3)          # foreground class index (reduction)
    n_s = pl.num_programs(2)

    @pl.when((s == 0) & (c == 0))
    def _init_out():
        inter_ref[...] = jnp.zeros_like(inter_ref)
        sumgt_ref[...] = jnp.zeros_like(sumgt_ref)

    y = y_ref[0, 0]                                   # (T, 128) int8/int32
    x_c = x_ref[0, 0]                                 # (T, 128) native dtype

    # Foreground class c+1 (background channel 0 is never DMA'd).
    eq = y.astype(jnp.int32) == (c + 1)
    # Select (not multiply) so garbage in partial trailing x blocks / padding
    # can never leak in: y is padded with background there, so eq is False.
    sel = jnp.where(eq, x_c, jnp.zeros_like(x_c))

    # Per-lane column sums only (VPU adds + tiny cross-sublane reduce);
    # the expensive cross-lane reduce is deferred to the last spatial tile.
    inter_part = jnp.sum(sel, axis=0, keepdims=True, dtype=jnp.float32)   # (1, 128)
    gt_part = jnp.sum(eq.astype(jnp.float32), axis=0, keepdims=True)      # (1, 128)

    @pl.when(s == 0)
    def _first():
        inter_acc[c] = inter_part
        gt_acc[c] = gt_part

    @pl.when(s > 0)
    def _accumulate():
        inter_acc[c] = inter_acc[c] + inter_part
        gt_acc[c] = gt_acc[c] + gt_part

    @pl.when(s == n_s - 1)
    def _finalize():
        col = jax.lax.broadcasted_iota(jnp.int32, inter_ref.shape, 3)
        onehot = (col == c).astype(jnp.float32)
        inter_ref[...] += onehot * jnp.sum(inter_acc[c])
        sumgt_ref[...] += onehot * jnp.sum(gt_acc[c])


def soft_skeleton_recall_loss(x, y, smooth=1.0, *, n_split=2,
                              max_tile_rows=_MAX_TILE_ROWS):
    """Forward of SoftSkeletonRecallLoss(apply_nonlin=None, batch_dice=False,
    do_bg=False) with integer class labels.

    x: (B, C, *spatial) float (f32 or bf16), C >= 2.
    y: (B, *spatial) or (B, 1, *spatial) integer labels in [0, C).
    """
    B, C = x.shape[0], x.shape[1]
    if C < 2:
        raise ValueError("skeleton recall needs at least one foreground channel (C >= 2)")
    n_fg = C - 1
    HW = 1
    for d in x.shape[2:]:
        HW *= d

    if y.ndim == x.ndim - 1:                # the y.view((b, 1, *spatial)) branch
        y = y[:, None]
    # TODO(synk): the "y already one-hot" branch and loss_mask weighting are not implemented.

    label_dtype = jnp.int8 if C <= 127 else jnp.int32
    xf = x.reshape(B, C, HW)                # native dtype (bf16 stays bf16 in HBM)
    yf = y.reshape(B, 1, HW).astype(label_dtype)

    # Lane + sublane-packing alignment (32 rows x 128 lanes).  x is copied only
    # when HW % 4096 != 0; it is never padded out to the tile grid.
    # TODO(synk): avoid this copy for misaligned HW via in-kernel tail masking.
    hw_aligned = _round_up(HW, _ROW_ALIGN * _LANE)
    if hw_aligned != HW:
        xf = jnp.pad(xf, ((0, 0), (0, 0), (0, hw_aligned - HW)))
    r_total = hw_aligned // _LANE                     # multiple of 32

    tile_rows = min(max_tile_rows, r_total)           # multiple of 32
    n_tiles = pl.cdiv(r_total, tile_rows)             # trailing x block may be partial
    n_s = pl.cdiv(n_tiles, n_split)                   # spatial tiles per split

    # Only the small label tensor is padded out to the full (n_split * n_s)
    # tile grid; padding value 0 = background, so padded / out-of-bounds /
    # clamped-duplicate regions contribute nothing to either sum.
    rows_y = n_split * n_s * tile_rows
    if rows_y * _LANE != HW:
        yf = jnp.pad(yf, ((0, 0), (0, 0), (0, rows_y * _LANE - HW)))
    x4 = xf.reshape(B, C, r_total, _LANE)
    y4 = yf.reshape(B, 1, rows_y, _LANE)

    def x_map(b, h, s, c):
        # Clamp so a split never issues a fully out-of-bounds x DMA; the
        # duplicate tile it fetches is masked by the all-background y tile.
        return (b, c + 1, jnp.minimum(h * n_s + s, n_tiles - 1), 0)

    def y_map(b, h, s, c):
        # Independent of c -> fetched once per spatial tile, reused across classes.
        return (b, 0, h * n_s + s, 0)

    out_spec = pl.BlockSpec((1, 1, 1, n_fg), lambda b, h, s, c: (b, h, 0, 0))

    inter_p, sumgt_p = pl.pallas_call(
        _skel_recall_kernel,
        out_shape=(jax.ShapeDtypeStruct((B, n_split, 1, n_fg), jnp.float32),
                   jax.ShapeDtypeStruct((B, n_split, 1, n_fg), jnp.float32)),
        grid_spec=pltpu.PrefetchScalarGridSpec(
            num_scalar_prefetch=0,
            grid=(B, n_split, n_s, n_fg),
            in_specs=[
                pl.BlockSpec((1, 1, tile_rows, _LANE), x_map),
                pl.BlockSpec((1, 1, tile_rows, _LANE), y_map),
            ],
            out_specs=[out_spec, out_spec],
            scratch_shapes=[pltpu.VMEM((n_fg, 1, _LANE), jnp.float32),
                            pltpu.VMEM((n_fg, 1, _LANE), jnp.float32)],
        ),
        compiler_params=pltpu.CompilerParams(
            dimension_semantics=("parallel", "parallel", "arbitrary", "arbitrary"),
            vmem_limit_bytes=_VMEM_LIMIT_BYTES),
    )(x4, y4)

    inter = inter_p[:, :, 0, :].sum(axis=1)           # (B, n_fg)
    sum_gt = sumgt_p[:, :, 0, :].sum(axis=1)

    # batch_dice=False, loss_mask=None, apply_nonlin=None.
    # TODO(synk): ddp AllGatherGrad branch (only active with batch_dice=True) not implemented.
    rec = (inter + smooth) / jnp.clip(sum_gt + smooth, 1e-8)
    return -jnp.mean(rec)


def _reference(x, y, smooth=1.0):
    """Pure-JAX reference mirroring the PyTorch forward (sanity check)."""
    x = x.astype(jnp.float32)
    C = x.shape[1]
    if y.ndim == x.ndim:
        y = y[:, 0]
    y_onehot = jax.nn.one_hot(y.astype(jnp.int32), C, axis=1,
                              dtype=jnp.float32)[:, 1:]
    x_fg = x[:, 1:]
    axes = tuple(range(2, x.ndim))
    inter = jnp.sum(x_fg * y_onehot, axis=axes)
    sum_gt = jnp.sum(y_onehot, axis=axes)
    rec = (inter + smooth) / jnp.clip(sum_gt + smooth, 1e-8)
    return -jnp.mean(rec)


if __name__ == "__main__":
    key = jax.random.PRNGKey(0)
    k1, k2, k3, k4, k5, k6 = jax.random.split(key, 6)

    # Canonical small demo: B=2, C=4, 16x16.
    B, C, H, W = 2, 4, 16, 16
    x = jax.random.normal(k1, (B, C, H, W), dtype=jnp.float32)
    y = jax.random.randint(k2, (B, H, W), 0, C, dtype=jnp.int32)
    loss = jax.block_until_ready(soft_skeleton_recall_loss(x, y, smooth=1.0))
    ref = jax.block_until_ready(_reference(x, y, smooth=1.0))
    assert jnp.allclose(loss, ref, rtol=1e-5, atol=1e-5), (loss, ref)

    # Odd 3-D shape with an explicit label channel dim (exercises the
    # lane/sublane alignment padding path).
    x = jax.random.normal(k3, (1, 3, 5, 7, 9), dtype=jnp.float32)
    y = jax.random.randint(k4, (1, 1, 5, 7, 9), 0, 3, dtype=jnp.int32)
    loss = jax.block_until_ready(soft_skeleton_recall_loss(x, y))
    ref = jax.block_until_ready(_reference(x, y))
    assert jnp.allclose(loss, ref, rtol=1e-5, atol=1e-5), (loss, ref)

    # Multi-tile case with an odd number of spatial tiles (exercises the
    # two-way core split, the tile-index clamp and multi-step accumulation).
    x = jax.random.normal(k5, (1, 3, 96, 128), dtype=jnp.float32)
    y = jax.random.randint(k6, (1, 96, 128), 0, 3, dtype=jnp.int32)
    loss = jax.block_until_ready(soft_skeleton_recall_loss(x, y, max_tile_rows=32))
    ref = jax.block_until_ready(_reference(x, y))
    assert jnp.allclose(loss, ref, rtol=1e-5, atol=1e-5), (loss, ref)

    print("KERNEL_OK")
</pallas_src>

<mosaic_0001>
module attributes {stable_mosaic.version = 11 : i64} {
  func.func @_skel_recall_kernel(%arg0: i32, %arg1: i32, %arg2: i32, %arg3: i32, %arg4: memref<1x1x32x128xf32, #tpu.memory_space<vmem>>, %arg5: memref<1x1x32x128xi8, #tpu.memory_space<vmem>>, %arg6: memref<1x1x1x3xf32, #tpu.memory_space<vmem>>, %arg7: memref<1x1x1x3xf32, #tpu.memory_space<vmem>>, %arg8: memref<3x1x128xf32, #tpu.memory_space<vmem>>, %arg9: memref<3x1x128xf32, #tpu.memory_space<vmem>>) attributes {dimension_semantics = [#tpu.dimension_semantics<parallel>, #tpu.dimension_semantics<parallel>, #tpu.dimension_semantics<arbitrary>, #tpu.dimension_semantics<arbitrary>], iteration_bounds = array<i64: 2, 2, 1, 3>, scalar_prefetch = 0 : i64, scratch_operands = 2 : i64, tpu.core_type = #tpu.core_type<tc>, window_params = [{transform_indices = @transform_0, window_bounds = array<i64: 1, 1, 32, 128>}, {transform_indices = @transform_1, window_bounds = array<i64: 1, 1, 32, 128>}, {transform_indices = @transform_2, window_bounds = array<i64: 1, 1, 1, 3>}, {transform_indices = @transform_3, window_bounds = array<i64: 1, 1, 1, 3>}]} {
    %c0_i32 = arith.constant 0 : i32
    %0 = arith.cmpi eq, %arg2, %c0_i32 : i32
    %c0_i32_0 = arith.constant 0 : i32
    %1 = arith.cmpi eq, %arg3, %c0_i32_0 : i32
    %2 = arith.andi %0, %1 : i1
    %3 = arith.extui %2 : i1 to i32
    %c0_i32_1 = arith.constant 0 : i32
    %4 = arith.cmpi ne, %3, %c0_i32_1 : i32
    scf.if %4 {
      %cst_17 = arith.constant 0.000000e+00 : f32
      %30 = vector.broadcast %cst_17 : f32 to vector<1x1x1x3xf32>
      %c0_18 = arith.constant 0 : index
      %c0_19 = arith.constant 0 : index
      %c0_20 = arith.constant 0 : index
      %c0_21 = arith.constant 0 : index
      %31 = vector.load %arg6[%c0_18, %c0_19, %c0_20, %c0_21] : memref<1x1x1x3xf32, #tpu.memory_space<vmem>>, vector<1x1x1x3xf32>
      tpu.vector_store %arg6[%c0_18, %c0_19, %c0_20, %c0_21], %30 {strides = array<i32>} : memref<1x1x1x3xf32, #tpu.memory_space<vmem>>, vector<1x1x1x3xf32>,
      %cst_22 = arith.constant 0.000000e+00 : f32
      %32 = vector.broadcast %cst_22 : f32 to vector<1x1x1x3xf32>
      %c0_23 = arith.constant 0 : index
      %c0_24 = arith.constant 0 : index
      %c0_25 = arith.constant 0 : index
      %c0_26 = arith.constant 0 : index
      %33 = vector.load %arg7[%c0_23, %c0_24, %c0_25, %c0_26] : memref<1x1x1x3xf32, #tpu.memory_space<vmem>>, vector<1x1x1x3xf32>
      tpu.vector_store %arg7[%c0_23, %c0_24, %c0_25, %c0_26], %32 {strides = array<i32>} : memref<1x1x1x3xf32, #tpu.memory_space<vmem>>, vector<1x1x1x3xf32>,
    } else {
    }
    %c0 = arith.constant 0 : index
    %c0_2 = arith.constant 0 : index
    %c0_3 = arith.constant 0 : index
    %c0_4 = arith.constant 0 : index
    %5 = vector.load %arg5[%c0, %c0_2, %c0_3, %c0_4] : memref<1x1x32x128xi8, #tpu.memory_space<vmem>>, vector<1x1x32x128xi8>
    %6 = vector.shape_cast %5 : vector<1x1x32x128xi8> to vector<32x128xi8>
    %c0_5 = arith.constant 0 : index
    %c0_6 = arith.constant 0 : index
    %c0_7 = arith.constant 0 : index
    %c0_8 = arith.constant 0 : index
    %7 = vector.load %arg4[%c0_5, %c0_6, %c0_7, %c0_8] : memref<1x1x32x128xf32, #tpu.memory_space<vmem>>, vector<1x1x32x128xf32>
    %8 = vector.shape_cast %7 : vector<1x1x32x128xf32> to vector<32x128xf32>
    %9 = arith.extsi %6 : vector<32x128xi8> to vector<32x128xi32>
    %c1_i32 = arith.constant 1 : i32
    %10 = arith.addi %arg3, %c1_i32 : i32
    %11 = vector.broadcast %10 : i32 to vector<32x128xi32>
    %12 = arith.cmpi eq, %9, %11 : vector<32x128xi32>
    %cst = arith.constant 0.000000e+00 : f32
    %13 = vector.broadcast %cst : f32 to vector<32x128xf32>
    %14 = arith.select %12, %8, %13 : vector<32x128xi1>, vector<32x128xf32>
    %cst_9 = arith.constant dense<0.000000e+00> : vector<128xf32>
    %15 = vector.multi_reduction <add>, %14, %cst_9 [0] : vector<32x128xf32> to vector<128xf32>
    %16 = vector.shape_cast %15 : vector<128xf32> to vector<1x128xf32>
    %17 = arith.extui %12 : vector<32x128xi1> to vector<32x128xi32>
    %18 = arith.sitofp %17 : vector<32x128xi32> to vector<32x128xf32>
    %cst_10 = arith.constant dense<0.000000e+00> : vector<128xf32>
    %19 = vector.multi_reduction <add>, %18, %cst_10 [0] : vector<32x128xf32> to vector<128xf32>
    %20 = vector.shape_cast %19 : vector<128xf32> to vector<1x128xf32>
    %c0_i32_11 = arith.constant 0 : i32
    %21 = arith.cmpi eq, %arg2, %c0_i32_11 : i32
    %22 = arith.extui %21 : i1 to i32
    %c0_i32_12 = arith.constant 0 : i32
    %23 = arith.cmpi ne, %22, %c0_i32_12 : i32
    scf.if %23 {
      %30 = arith.index_cast %arg3 : i32 to index
      %c0_17 = arith.constant 0 : index
      %c0_18 = arith.constant 0 : index
      %31 = vector.load %arg8[%30, %c0_17, %c0_18] : memref<3x1x128xf32, #tpu.memory_space<vmem>>, vector<1x1x128xf32>
      %32 = vector.shape_cast %31 : vector<1x1x128xf32> to vector<1x128xf32>
      %33 = vector.shape_cast %16 : vector<1x128xf32> to vector<1x1x128xf32>
      tpu.vector_store %arg8[%30, %c0_17, %c0_18], %33 {strides = array<i32>} : memref<3x1x128xf32, #tpu.memory_space<vmem>>, vector<1x1x128xf32>,
      %34 = arith.index_cast %arg3 : i32 to index
      %c0_19 = arith.constant 0 : index
      %c0_20 = arith.constant 0 : index
      %35 = vector.load %arg9[%34, %c0_19, %c0_20] : memref<3x1x128xf32, #tpu.memory_space<vmem>>, vector<1x1x128xf32>
      %36 = vector.shape_cast %35 : vector<1x1x128xf32> to vector<1x128xf32>
      %37 = vector.shape_cast %20 : vector<1x128xf32> to vector<1x1x128xf32>
      tpu.vector_store %arg9[%34, %c0_19, %c0_20], %37 {strides = array<i32>} : memref<3x1x128xf32, #tpu.memory_space<vmem>>, vector<1x1x128xf32>,
    } else {
    }
    %c0_i32_13 = arith.constant 0 : i32
    %24 = arith.cmpi sgt, %arg2, %c0_i32_13 : i32
    %25 = arith.extui %24 : i1 to i32
    %c0_i32_14 = arith.constant 0 : i32
    %26 = arith.cmpi ne, %25, %c0_i32_14 : i32
    scf.if %26 {
      %30 = arith.index_cast %arg3 : i32 to index
      %c0_17 = arith.constant 0 : index
      %c0_18 = arith.constant 0 : index
      %31 = vector.load %arg8[%30, %c0_17, %c0_18] : memref<3x1x128xf32, #tpu.memory_space<vmem>>, vector<1x1x128xf32>
      %32 = vector.shape_cast %31 : vector<1x1x128xf32> to vector<1x128xf32>
      %33 = arith.addf %32, %16 : vector<1x128xf32>
      %34 = arith.index_cast %arg3 : i32 to index
      %c0_19 = arith.constant 0 : index
      %c0_20 = arith.constant 0 : index
      %35 = vector.load %arg8[%34, %c0_19, %c0_20] : memref<3x1x128xf32, #tpu.memory_space<vmem>>, vector<1x1x128xf32>
      %36 = vector.shape_cast %35 : vector<1x1x128xf32> to vector<1x128xf32>
      %37 = vector.shape_cast %33 : vector<1x128xf32> to vector<1x1x128xf32>
      tpu.vector_store %arg8[%34, %c0_19, %c0_20], %37 {strides = array<i32>} : memref<3x1x128xf32, #tpu.memory_space<vmem>>, vector<1x1x128xf32>,
      %38 = arith.index_cast %arg3 : i32 to index
      %c0_21 = arith.constant 0 : index
      %c0_22 = arith.constant 0 : index
      %39 = vector.load %arg9[%38, %c0_21, %c0_22] : memref<3x1x128xf32, #tpu.memory_space<vmem>>, vector<1x1x128xf32>
      %40 = vector.shape_cast %39 : vector<1x1x128xf32> to vector<1x128xf32>
      %41 = arith.addf %40, %20 : vector<1x128xf32>
      %42 = arith.index_cast %arg3 : i32 to index
      %c0_23 = arith.constant 0 : index
      %c0_24 = arith.constant 0 : index
      %43 = vector.load %arg9[%42, %c0_23, %c0_24] : memref<3x1x128xf32, #tpu.memory_space<vmem>>, vector<1x1x128xf32>
      %44 = vector.shape_cast %43 : vector<1x1x128xf32> to vector<1x128xf32>
      %45 = vector.shape_cast %41 : vector<1x128xf32> to vector<1x1x128xf32>
      tpu.vector_store %arg9[%42, %c0_23, %c0_24], %45 {strides = array<i32>} : memref<3x1x128xf32, #tpu.memory_space<vmem>>, vector<1x1x128xf32>,
    } else {
    }
    %c0_i32_15 = arith.constant 0 : i32
    %27 = arith.cmpi eq, %arg2, %c0_i32_15 : i32
    %28 = arith.extui %27 : i1 to i32
    %c0_i32_16 = arith.constant 0 : i32
    %29 = arith.cmpi ne, %28, %c0_i32_16 : i32
    scf.if %29 {
      %30 = tpu.iota {dimensions = array<i32: 3>} : vector<1x1x1x3xi32>
      %31 = vector.broadcast %arg3 : i32 to vector<1x1x1x3xi32>
      %32 = arith.cmpi eq, %30, %31 : vector<1x1x1x3xi32>
      %33 = arith.extui %32 : vector<1x1x1x3xi1> to vector<1x1x1x3xi32>
      %34 = arith.sitofp %33 : vector<1x1x1x3xi32> to vector<1x1x1x3xf32>
      %c0_17 = arith.constant 0 : index
      %c0_18 = arith.constant 0 : index
      %c0_19 = arith.constant 0 : index
      %c0_20 = arith.constant 0 : index
      %35 = vector.load %arg6[%c0_17, %c0_18, %c0_19, %c0_20] : memref<1x1x1x3xf32, #tpu.memory_space<vmem>>, vector<1x1x1x3xf32>
      %36 = arith.index_cast %arg3 : i32 to index
      %c0_21 = arith.constant 0 : index
      %c0_22 = arith.constant 0 : index
      %37 = vector.load %arg8[%36, %c0_21, %c0_22] : memref<3x1x128xf32, #tpu.memory_space<vmem>>, vector<1x1x128xf32>
      %38 = vector.shape_cast %37 : vector<1x1x128xf32> to vector<1x128xf32>
      %39 = vector.shape_cast %38 : vector<1x128xf32> to vector<1x1x128xf32>
      %cst_23 = arith.constant dense<0.000000e+00> : vector<1xf32>
      %40 = vector.multi_reduction <add>, %39, %cst_23 [1, 2] : vector<1x1x128xf32> to vector<1xf32>
      %41 = vector.shape_cast %40 : vector<1xf32> to vector<1x1x1xf32>
      %42 = vector.extract %41[0, 0, 0] : f32 from vector<1x1x1xf32>
      %43 = vector.broadcast %42 : f32 to vector<1x1x1x3xf32>
      %44 = arith.mulf %34, %43 : vector<1x1x1x3xf32>
      %45 = arith.addf %35, %44 : vector<1x1x1x3xf32>
      %c0_24 = arith.constant 0 : index
      %c0_25 = arith.constant 0 : index
      %c0_26 = arith.constant 0 : index
      %c0_27 = arith.constant 0 : index
      %46 = vector.load %arg6[%c0_24, %c0_25, %c0_26, %c0_27] : memref<1x1x1x3xf32, #tpu.memory_space<vmem>>, vector<1x1x1x3xf32>
      tpu.vector_store %arg6[%c0_24, %c0_25, %c0_26, %c0_27], %45 {strides = array<i32>} : memref<1x1x1x3xf32, #tpu.memory_space<vmem>>, vector<1x1x1x3xf32>,
      %c0_28 = arith.constant 0 : index
      %c0_29 = arith.constant 0 : index
      %c0_30 = arith.constant 0 : index
      %c0_31 = arith.constant 0 : index
      %47 = vector.load %arg7[%c0_28, %c0_29, %c0_30, %c0_31] : memref<1x1x1x3xf32, #tpu.memory_space<vmem>>, vector<1x1x1x3xf32>
      %48 = arith.index_cast %arg3 : i32 to index
      %c0_32 = arith.constant 0 : index
      %c0_33 = arith.constant 0 : index
      %49 = vector.load %arg9[%48, %c0_32, %c0_33] : memref<3x1x128xf32, #tpu.memory_space<vmem>>, vector<1x1x128xf32>
      %50 = vector.shape_cast %49 : vector<1x1x128xf32> to vector<1x128xf32>
      %51 = vector.shape_cast %50 : vector<1x128xf32> to vector<1x1x128xf32>
      %cst_34 = arith.constant dense<0.000000e+00> : vector<1xf32>
      %52 = vector.multi_reduction <add>, %51, %cst_34 [1, 2] : vector<1x1x128xf32> to vector<1xf32>
      %53 = vector.shape_cast %52 : vector<1xf32> to vector<1x1x1xf32>
      %54 = vector.extract %53[0, 0, 0] : f32 from vector<1x1x1xf32>
      %55 = vector.broadcast %54 : f32 to vector<1x1x1x3xf32>
      %56 = arith.mulf %34, %55 : vector<1x1x1x3xf32>
      %57 = arith.addf %47, %56 : vector<1x1x1x3xf32>
      %c0_35 = arith.constant 0 : index
      %c0_36 = arith.constant 0 : index
      %c0_37 = arith.constant 0 : index
      %c0_38 = arith.constant 0 : index
      %58 = vector.load %arg7[%c0_35, %c0_36, %c0_37, %c0_38] : memref<1x1x1x3xf32, #tpu.memory_space<vmem>>, vector<1x1x1x3xf32>
      tpu.vector_store %arg7[%c0_35, %c0_36, %c0_37, %c0_38], %57 {strides = array<i32>} : memref<1x1x1x3xf32, #tpu.memory_space<vmem>>, vector<1x1x1x3xf32>,
    } else {
    }
    return
  }
  func.func @transform_0(%arg0: i32, %arg1: i32, %arg2: i32, %arg3: i32) -> (i32, i32, i32, i32) {
    %c1_i32 = arith.constant 1 : i32
    %0 = arith.addi %arg3, %c1_i32 : i32
    %c1_i32_0 = arith.constant 1 : i32
    %1 = arith.muli %arg1, %c1_i32_0 : i32
    %2 = arith.addi %1, %arg2 : i32
    %c0_i32 = arith.constant 0 : i32
    %3 = arith.minsi %2, %c0_i32 : i32
    %c0_i32_1 = arith.constant 0 : i32
    %c0_i32_2 = arith.constant 0 : i32
    return %arg0, %0, %3, %c0_i32_1 : i32, i32, i32, i32
  }
  func.func @transform_1(%arg0: i32, %arg1: i32, %arg2: i32, %arg3: i32) -> (i32, i32, i32, i32) {
    %c1_i32 = arith.constant 1 : i32
    %0 = arith.muli %arg1, %c1_i32 : i32
    %1 = arith.addi %0, %arg2 : i32
    %c0_i32 = arith.constant 0 : i32
    %c0_i32_0 = arith.constant 0 : i32
    %c0_i32_1 = arith.constant 0 : i32
    return %arg0, %c0_i32, %1, %c0_i32_0 : i32, i32, i32, i32
  }
  func.func @transform_2(%arg0: i32, %arg1: i32, %arg2: i32, %arg3: i32) -> (i32, i32, i32, i32) {
    %c0_i32 = arith.constant 0 : i32
    %c0_i32_0 = arith.constant 0 : i32
    %c0_i32_1 = arith.constant 0 : i32
    return %arg0, %arg1, %c0_i32, %c0_i32_0 : i32, i32, i32, i32
  }
  func.func @transform_3(%arg0: i32, %arg1: i32, %arg2: i32, %arg3: i32) -> (i32, i32, i32, i32) {
    %c0_i32 = arith.constant 0 : i32
    %c0_i32_0 = arith.constant 0 : i32
    %c0_i32_1 = arith.constant 0 : i32
    return %arg0, %arg1, %c0_i32, %c0_i32_0 : i32, i32, i32, i32
  }
}

</mosaic_0001>

<bundles_post_ra>
// kernel: tpu_custom_call.1
= control target key start
LH: loop header
LB: loop body
LE: loop exit
PB: predicated region body
PF: predicated region fallthrough
CT: control target
= control target key end

     0   :  { %s1420_s0 = inlined_call_operand.hbm [shape: f32[2,4,32,128], index: 0, kind: input, shape index: {}]   ;;  %s1421_s1 = inlined_call_operand.hbm [shape: s8[2,1,64,128], index: 1, kind: input, shape index: {}]   ;;  %s1422_s2 = inlined_call_operand.hbm [shape: f32[2,2,1,3], index: 2, kind: output, shape index: {0}]   ;;  %s1423_s3 = inlined_call_operand.hbm [shape: f32[2,2,1,3], index: 3, kind: output, shape index: {1}]  }
   0x1   :  { %1433 = sst [smem:[#allocation20_spill]] %s1420_s0 }
   0x2   :  { %1434 = sst [smem:[#allocation21_spill]] %s1422_s2 }
   0x3   :  { %1435 = sst [smem:[#allocation22_spill]] %s1423_s3 }
   0x4   :  { %9 = vsyncpa [#allocation5], 0 }
   0x5   :  { %11 = vsyncpa [#allocation5 + $0x1], 0 }
   0x6   :  { %12 = vsyncpa [#allocation8], 0 }
   0x7   :  { %14 = vsyncpa [#allocation8 + $0x1], 0 }
   0x8   :  { %15 = vsyncpa [#allocation6], 0 }
   0x9   :  { %17 = vsyncpa [#allocation6 + $0x1], 0 }
   0xa   :  { %18 = vsyncpa [#allocation11], 0 }
   0xb   :  { %20 = vsyncpa [#allocation11 + $0x1], 0  ;;  %s1035_s12 = smov 0   ;;  %s1037_s13 = smov 0  }
   0xc   :  { %s1039_s14 = smov 0   ;;  %s1041_s15 = smov 0  }
   0xd   :  { %s1043_s16 = smov 0   ;;  %s1045_s17 = smov 0  }
   0xe   :  { %s1047_s18 = smov 0   ;;  %s1049_s19 = smov 0  }
   0xf   :  { %s1051_s20 = smov 0   ;;  %s1053_s21 = smov 0  }
  0x10   :  { %s1055_s22 = smov 0   ;;  %s1057_s23 = smov 0  }
  0x11   :  { %s1059_s24 = smov 0  }
  0x12 LB: > { %1436 = sst [smem:[#allocation16_spill]] %s985_s19  ;;  %s41_s25 = sadd.s32 1, %s993_s21  ;;  %s1005_s24 = sphi %s1059_s24, %s26_s24   ;;  %s1001_s23 = sphi %s1057_s23, %s1476_s23   ;;  %s997_s22 = sphi %s1055_s22, %s1475_s22   ;;  %s993_s21 = sphi %s1053_s21, %s1474_s21   ;;  %s989_s20 = sphi %s1051_s20, %s1473_s20   ;;  %s985_s19 = sphi %s1049_s19, %s1472_s19   ;;  %s981_s18 = sphi %s1047_s18, %s1471_s18   ;;  %s977_s17 = sphi %s1045_s17, %s1470_s17   ;;  %s973_s16 = sphi %s1043_s16, %s1469_s16   ;;  %s969_s15 = sphi %s1041_s15, %s1468_s15   ;;  %s965_s14 = sphi %s1039_s14, %s1467_s14   ;;  %s961_s13 = sphi %s1037_s13, %s1466_s13   ;;  %s957_s12 = sphi %s1035_s12, %s1465_s12  }
  0x13   : > { %1437 = sst [smem:[#allocation17_spill]] %s989_s20  ;;  %s48_s26 = sadd.s32 1, %s997_s22 }
  0x14   : > { %p42_p0 = scmp.ge.s32.totalorder %s41_s25, 3  ;;  %s52_s27 = sadd.s32 1, %s1001_s23 }
  0x15   : > { %s71_s28 = sadd.s32 1, %s977_s17  ;;  %p78_p2 = scmp.ne.s32.totalorder %s977_s17, %s973_s16 }
  0x16   : > { %s1104_s29 = scalar_select %p42_p0, 0, %s41_s25  }
  0x17   : > { %s1478_s26 = smov (!%p42_p0, %s48_s26), %s997_s22  ;;  %p1429_p3 = scmp.eq.s32.totalorder %s1005_s24, 0 }
  0x18   : > { %1438 = sst [smem:[#allocation18_spill]] %s1104_s29  ;;  %p50_p1 = scmp.ge.s32.totalorder %s1478_s26, 2 }
  0x19   : > { %s60_s30 = sadd.s32 1, %s1104_s29  ;;  %p84_p5 = scmp.ne.s32.totalorder %s973_s16, %s969_s15 }
  0x1a   : > { %s65_s4 = ssub.s32 %s41_s25, %s60_s30  ;;  %s1480_s26 = smov (%p50_p1, %s1478_s26), 0 }
  0x1b   : > { %s1482_s27 = smov (!%p50_p1, %s52_s27), %s1001_s23  ;;  %p1120_p6 = por %p1429_p3, %p78_p2 }
  0x1c   : > { %p54_p4 = scmp.ge.s32.totalorder %s1482_s27, 2  ;;  %p1428_p7 = scmp.lt.s32.totalorder %s1005_s24, 12 }
  0x1d   : > { %s194_s8 = sand.u32 1, %s977_s17   ;;  %s612_s11 = sshll.u32 %s993_s21, 2 }
  0x1e   : > { %s1484_s27 = smov (%p54_p4, %s1482_s27), 0  ;;  %s610_s9 = sshll.u32 %s194_s8, 5 }
  0x1f   : > { %1439 = sst [smem:[#allocation19_spill]] %s1484_s27  ;;  %s1126_s6 = ssub.s32 %s1001_s23, %s1484_s27 }
  0x20   : > { %s66_s7 = sor.u32 %s65_s4, %s1126_s6  ;;  %s613_s25 = sshll.u32 %s1001_s23, 4 }
  0x21   : > { %p69_p8 = scmp.eq.s32.totalorder %s66_s7, 0  ;;  %s494_s30 = sadd.s32 %s613_s25, %s612_s11 }
  0x22   : > { %s198_s29 = scalar_lea.vmem [#allocation4], %s610_s9  ;;  %s614_s2 = sshll.u32 %s494_s30, 7 }
  0x23   : > { %s1132_s10 = scalar_select %p69_p8, %s977_s17, %s71_s28  }
  0x24   : > { %s213_s3 = sshll.u32 %s198_s29, 4  ;;  %s1441_s0 = sld [smem:[#allocation20_spill]]  ;;  %s1136_s3 = int_to_ptr.vmem [resolvable:$true] %s213_s3 }
  0x25   : > { %p1145_p9 = pnand %p1428_p7, %p1120_p6  ;;  %s1151_s29 = scalar_lea.sflag [#allocation5], %s194_s8 }
  0x27   : > { %p772_p11 = pneg %p1145_p9 }
  0x2a   : > { %s496_s27 = scalar_lea.hbm %s1441_s0, %s614_s2  ;;  %s775_s20 = scalar_lea.hbm %s1441_s0, 4096 }
  0x2b   : > { %s1149_s28 = scalar_lea.hbm %s496_s27, 512  ;;  %s800_s7 = scalar_lea.hbm %s496_s27, 1024 }
  0x2c   : > { %p771_p10 = scmp.ne.s32.totalorder %s1149_s28, %s800_s7  ;;  %p776_p0 = scmp.lt.u32.totalorder %s1149_s28, %s1441_s0 }
  0x2d   : > { %p777_p1 = scmp.lt.u32.totalorder %s775_s20, %s800_s7  ;;  %p779_p4 = scmp.lt.u32.totalorder %s800_s7, %s1149_s28 }
  0x2e   : > { %p773_p12 = pnand %p772_p11, %p771_p10 }
  0x2f   : > { %p778_p2 = por %p777_p1, %p776_p0 }
  0x30   : > { %p774_p13 = pneg %p773_p12 }
  0x31   : > { %p780_p6 = por %p779_p4, %p778_p2 }
  0x33   : > { %p781_p8 = pnand %p780_p6, %p774_p13 }
  0x35   : > { %784 = shalt.err (!%p781_p8)
}
  0x36   : > { %s785_s27 = scalar_lea.vmem %s1136_s3, 512  ;;  %s1007_s8 = smov [#allocation4]  }
  0x37   : > { %p786_p10 = scmp.ne.s32.totalorder %s1136_s3, %s785_s27  ;;  %s790_s11 = sshll.u32 %s1007_s8, 4  ;;  %s791_s11 = int_to_ptr.vmem [resolvable:$false] %s790_s11 }
  0x38   : > { %s792_s25 = scalar_lea.vmem %s791_s11, 1024  ;;  %p793_p3 = scmp.lt.s32.totalorder %s1136_s3, %s791_s11 }
  0x39   : > { %p788_p12 = pnand %p786_p10, %p772_p11  ;;  %p794_p0 = scmp.lt.s32.totalorder %s792_s25, %s785_s27 }
  0x3b   : > { %p789_p7 = pneg %p788_p12  ;;  %p795_p1 = por %p794_p0, %p793_p3 }
  0x3d   : > { %p796_p2 = pnand %p795_p1, %p789_p7 }
  0x3f   : > { %799 = shalt.err (!%p796_p2)
}
  0x40   : > { %s1008_s30 = smov 128   ;;  %s1009_s7 = smov 8  }
  0x41   : > { %649 = dma.hbm_to_vmem [thread:$0]  (!%p1145_p9), %s1149_s28, 512, %s1136_s3, %s1151_s29, %s1008_s30, %s1008_s30, %s1009_s7  }
  0x42   : > { %p618_p3 = scmp.ge.s32.totalorder %s1005_s24, 1  ;;  %p242_p7 = scmp.lt.s32.totalorder %s1005_s24, 13 }
  0x43   : > { %s606_s19 = sadd.s32 4294967295, %s1005_s24   ;;  %s607_s20 = sadd.s32 4294967294, %s1005_s24  }
  0x44   : > { %p1180_p11 = pnand %p618_p3, %p242_p7  ;;  %p85_p13 = scmp.eq.s32.totalorder %s606_s19, 0 }
  0x45   : > { %s97_s5 = ssub.s32 %s997_s22, %s1480_s26  ;;  %s101_s9 = sadd.s32 1, %s965_s14 }
  0x46   : > { %p1192_p4 = por %p85_p13, %p84_p5  ;;  %s98_s3 = sor.u32 %s97_s5, %s1126_s6 }
  0x47   : > { %p99_p9 = scmp.eq.s32.totalorder %s98_s3, 0  ;;  %p108_p6 = scmp.ne.s32.totalorder %s965_s14, %s961_s13 }
  0x48   : > { %s1444_s4 = scalar_select %p1192_p4, 1, 0 }
  0x49   : > { %p114_p8 = scmp.ne.s32.totalorder %s961_s13, %s957_s12  ;;  %p140_p10 = scmp.eq.s32.totalorder %s606_s19, 11 }
  0x4a   : > { %s1202_s28 = scalar_select %p99_p9, %s965_s14, %s101_s9  }
  0x4b   : > { %p1445_p12 = scmp.eq.s32.totalorder %s1005_s24, 0  ;;  %p1210_p1 = por %p114_p8, %p85_p13 }
  0x4c   : > { %p1214_p5 = por %p140_p10, %p108_p6  ;;  %p146_p2 = scmp.eq.s32.totalorder %s607_s20, 11 }
  0x4d   : > { %p1206_p0 = por %p108_p6, %p1445_p12  ;;  %s223_s6 = sand.u32 1, %s965_s14  }
  0x4e   : > { %s1447_s15 = scalar_select %p1210_p1, 1, 0 }
  0x4f   : > { %s1448_s27 = scalar_select %p1214_p5, 1, 0 }
  0x50   : > { %s616_s8 = sshll.u32 %s1001_s23, 1  ;;  %p1220_p3 = por %p146_p2, %p114_p8 }
  0x51   : > { %s615_s25 = sshll.u32 %s223_s6, 3  ;;  %s233_s30 = sadd.s32 %s997_s22, %s616_s8 }
  0x52   : > { %s1449_s11 = scalar_select %p1220_p3, 1, 0 }
  0x53   : > { %s617_s7 = sshll.u32 %s233_s30, 7  ;;  %s227_s3 = scalar_lea.vmem [#allocation7], %s615_s25 }
  0x54   : > { %s1228_s9 = scalar_lea.hbm %s1421_s1, %s617_s7  ;;  %s237_s20 = sshll.u32 %s227_s3, 4  ;;  %s1230_s20 = int_to_ptr.vmem [resolvable:$true] %s237_s20 }
  0x55   : > { %p1450_p7 = scmp.lt.s32.totalorder %s1005_s24, 12  ;;  %s224_s8 = scalar_lea.sflag [#allocation8], %s223_s6 }
  0x56   : > { %s801_s30 = scalar_lea.hbm %s1228_s9, 128  ;;  %s806_s29 = scalar_lea.hbm %s1421_s1, 512 }
  0x57   : > { %p1236_p13 = pnand %p1450_p7, %p1206_p0  ;;  %p802_p9 = scmp.ne.s32.totalorder %s1228_s9, %s801_s30 }
  0x58   : > { %p807_p12 = scmp.lt.u32.totalorder %s1228_s9, %s1421_s1  ;;  %p808_p0 = scmp.lt.u32.totalorder %s806_s29, %s801_s30 }
  0x59   : > { %p803_p6 = pneg %p1236_p13  ;;  %p810_p7 = scmp.lt.u32.totalorder %s801_s30, %s1228_s9 }
  0x5a   : > { %p809_p2 = por %p808_p0, %p807_p12 }
  0x5b   : > { %p804_p8 = pnand %p803_p6, %p802_p9 }
  0x5c   : > { %p811_p3 = por %p810_p7, %p809_p2 }
  0x5d   : > { %p805_p10 = pneg %p804_p8 }
  0x5f   : > { %p812_p5 = pnand %p811_p3, %p805_p10 }
  0x61   : > { %815 = shalt.err (!%p812_p5)
}
  0x62   : > { %s816_s6 = scalar_lea.vmem %s1230_s20, 128  ;;  %s1010_s3 = smov [#allocation7]  }
  0x63   : > { %p817_p9 = scmp.ne.s32.totalorder %s1230_s20, %s816_s6  ;;  %s821_s25 = sshll.u32 %s1010_s3, 4  ;;  %s822_s25 = int_to_ptr.vmem [resolvable:$false] %s821_s25 }
  0x64   : > { %s823_s7 = scalar_lea.vmem %s822_s25, 256  ;;  %p824_p4 = scmp.lt.s32.totalorder %s1230_s20, %s822_s25 }
  0x65   : > { %p819_p8 = pnand %p817_p9, %p803_p6  ;;  %p825_p12 = scmp.lt.s32.totalorder %s823_s7, %s816_s6 }
  0x67   : > { %p820_p1 = pneg %p819_p8  ;;  %p826_p0 = por %p825_p12, %p824_p4 }
  0x69   : > { %p827_p2 = pnand %p826_p0, %p820_p1 }
  0x6b   : > { %830 = shalt.err (!%p827_p2)
}
  0x6c   : > { %652 = dma.hbm_to_vmem [thread:$0]  (!%p1236_p13), %s1228_s9, 128, %s1230_s20, %s224_s8  }
  0x6d   : > { %246 = sbr.rel (%p1180_p11) target bundleno = 412 (0x19c), region = 28  ;;  %s248_s30 = sand.u32 (!%p1180_p11), 1, %s973_s16  }
  0x6e   : > { %s619_s29 = sshll.u32 (!%p1180_p11), %s248_s30, 5  ;;  %s249_s19 = scalar_lea.sflag (!%p1180_p11), [#allocation5], %s248_s30 }
  0x6f   : > { %s252_s5 = scalar_lea.vmem (!%p1180_p11), [#allocation4], %s619_s29  ;;  %p1452_p5 = scmp.ne.s32.totalorder (!%p1180_p11), %s1444_s4, 0 }
  0x74   : > { %940 = dma.done.wait (%p1452_p5), %s249_s19, 512  }
  0x75   : > { %942 = vsyncadd (%p1452_p5), %s249_s19, 4294966784  ;;  %s1273_s0 = sand.u32 1, %s961_s13   ;;  %p1453_p11 = scmp.ne.s32.totalorder %s1447_s15, 0 }
  0x76   : > { %s620_s9 = sshll.u32 %s1273_s0, 3  ;;  %s258_s2 = scalar_lea.sflag [#allocation8], %s1273_s0 }
  0x77   : > { %s261_s20 = scalar_lea.vmem [#allocation7], %s620_s9 }
  0x78   : > { %944 = dma.done.wait (%p1453_p11), %s258_s2, 128  }
  0x79   : > { %946 = vsyncadd (%p1453_p11), %s258_s2, 4294967168  ;;  %p299_p4 = scmp.eq.s32.totalorder %s981_s18, 0  ;;  %s1283_s4 = scalar_lea.vmem [#allocation9], %s1273_s0 }
  0x7a   : > { %s1286_s8 = scalar_lea.vmem [#allocation10], %s1273_s0  ;;  %vm304_vm0 = vcmask (%p299_p4), 16384   ;;  %v1011_v0 = vmov (%p299_p4), 0.0  }
  0x7b   : > { %303 = sbr.rel (!%p299_p4) target bundleno = 130 (0x82), region = 40  ;;  %305 = vst.msk [vmem:[%s1283_s4] sm:$0x1] (%p299_p4), %vm304_vm0, %v1011_v0  ;;  %306 = vst.msk [vmem:[%s1286_s8] sm:$0x1] (%p299_p4), %vm304_vm0, %v1011_v0 }
  0x82 PF: > { %v307_v1 = vld [vmem:[%s261_s20] sm:$0xff]  ;;  %s316_s15 = sadd.s32 1, %s981_s18  ;;  %v310_v4 = vld [vmem:[%s252_s5 + $0x10] sm:$0xff]  ;;  %v311_v10 = vld [vmem:[%s252_s5 + $0x18] sm:$0xff]  ;;  %v1012_v15 = vmov 0.0   ;;  %s355_s6 = scalar_lea.vmem [#allocation2], %s981_s18  ;;  %v374_v56 = vlaneseq  ;;  %v376_v58 = vstv %s981_s18 }
  0x83   : > { %v308_v2 = vld [vmem:[%s252_s5] sm:$0xff]  ;;  %v309_v3 = vld [vmem:[%s252_s5 + $0x8] sm:$0xff]  ;;  %v312_v5 = vunpack.c.0.s8 %v307_v1  ;;  %v313_v6 = vunpack.c.1.s8 %v307_v1  ;;  %v314_v7 = vunpack.c.2.s8 %v307_v1  ;;  %v315_v8 = vunpack.c.3.s8 %v307_v1  ;;  %s357_s3 = scalar_lea.vmem [#allocation3], %s981_s18  ;;  %s1454_s25 = sld [smem:[#allocation17_spill]]  ;;  %v380_v60 = vld [vmem:[%s1283_s4] sm:$0x1] }
  0x84   : > { %v317_v9 = vstv %s316_s15  ;;  %vm383_vm5 = vcmask 1040384   ;;  %s1455_s7 = sld [smem:[#allocation16_spill]]  ;;  %v375_v57 = vand.u32 127, %v374_v56  ;;  %s435_s9 = sshll.u32 %s1283_s4, 4  ;;  %vm397_vm7 = vcmask 16384   ;;  %s1308_s9 = int_to_ptr.vmem [resolvable:$true] %s435_s9 }
  0x85   : > { %vm318_vm1 = vcmp.eq.s32.totalorder %v312_v5, %v317_v9  ;;  %vm319_vm2 = vcmp.eq.s32.totalorder %v313_v6, %v317_v9  ;;  %vm320_vm3 = vcmp.eq.s32.totalorder %v314_v7, %v317_v9  ;;  %vm321_vm4 = vcmp.eq.s32.totalorder %v315_v8, %v317_v9  ;;  %s1456_s20 = sld [smem:[#allocation21_spill]]  ;;  %v399_v0 = vld [vmem:[%s1286_s8] sm:$0x1]  ;;  %p1458_p3 = scmp.ne.s32.totalorder %s1448_s27, 0 }
  0x86   : > { %v322_v11 = vsel %vm318_vm1, %v308_v2, 0.0  ;;  %v323_v12 = vsel %vm319_vm2, %v309_v3, 0.0  ;;  %v324_v13 = vsel %vm320_vm3, %v310_v4, 0.0  ;;  %v622_v16 = vsel %vm318_vm1, 1.0, %v1012_v15 }
  0x87   : > { %v326_v14 = vadd.f32 %v323_v12, %v322_v11  ;;  %v623_v17 = vsel %vm319_vm2, 1.0, %v1012_v15  ;;  %v624_v18 = vsel %vm320_vm3, 1.0, %v1012_v15  ;;  %v325_v19 = vsel %vm321_vm4, %v311_v10, 0.0 }
  0x88   : > { %v343_v20 = vadd.f32 %v623_v17, %v622_v16  ;;  %v625_v22 = vsel %vm321_vm4, 1.0, %v1012_v15  ;;  %vm377_vm6 = vcmp.eq.s32.totalorder %v375_v57, %v376_v58 }
  0x89   : > { %v327_v21 = vadd.f32 %v326_v14, %v324_v13  ;;  %s627_s30 = sshll.u32 %s1454_s25, 1  ;;  %v626_v59 = vsel %vm377_vm6, 1.0, %v1012_v15 }
  0x8a   : > { %v344_v23 = vadd.f32 %v624_v18, %v343_v20  ;;  %s1296_s29 = sadd.s32 %s1455_s7, %s627_s30  ;;  %s417_s7 = scalar_lea.sflag [#allocation6], %s1273_s0 }
  0x8b   : > { %v328_v24 = vadd.f32 %v327_v21, %v325_v19  ;;  %s628_s5 = sshll.u32 %s1296_s29, 4  ;;  %s831_s30 = scalar_lea.vmem %s1308_s9, 16 }
  0x8c   : > { %v345_v25 = vadd.f32 %v625_v22, %v344_v23  ;;  %s1306_s15 = scalar_lea.hbm %s1456_s20, %s628_s5  ;;  %p832_p1 = scmp.ne.s32.totalorder %s1308_s9, %s831_s30 }
  0x8d   : > { %v329_v26 = vrot.slane %v328_v24, 4 }
  0x8e   : > { %v346_v27 = vrot.slane %v345_v25, 4  ;;  %p833_p13 = pnand %p832_p1, %p1458_p3 }
  0x8f   : > { %v330_v28 = vadd.f32 %v329_v26, %v328_v24 }
  0x90   : > { %v347_v29 = vadd.f32 %v346_v27, %v345_v25  ;;  %p834_p6 = pneg %p833_p13 }
  0x91   : > { %v331_v30 = vrot.slane %v330_v28, 2 }
  0x92   : > { %v348_v31 = vrot.slane %v347_v29, 2 }
  0x93   : > { %v332_v32 = vadd.f32 %v331_v30, %v330_v28 }
  0x94   : > { %v349_v33 = vadd.f32 %v348_v31, %v347_v29 }
  0x95   : > { %v333_v34 = vrot.slane %v332_v32, 1 }
  0x96   : > { %v350_v35 = vrot.slane %v349_v33, 1 }
  0x97   : > { %v334_v36 = vadd.f32 %v333_v34, %v332_v32 }
  0x98   : > { %v351_v37 = vadd.f32 %v350_v35, %v349_v33 }
  0x99   : > { %356 = vst [vmem:[%s355_s6] sm:$0x1] %v334_v36 }
  0x9a   : > { %358 = vst [vmem:[%s357_s3] sm:$0x1] %v351_v37 }
  0xa0   : > { %v382_v38 = vld [vmem:[%s355_s6] sm:$0x1]  ;;  %s1457_s6 = smov %s1456_s20 }
  0xa1   : > { %v384_v39 = vsel %vm383_vm5, %v382_v38, 0.0  ;;  %v401_v40 = vld [vmem:[%s357_s3] sm:$0x1] }
  0xa2   : > { %385 = vadd.xlane.f32.xlu0 %v384_v39  ;;  %v402_v41 = vsel %vm383_vm5, %v401_v40, 0.0 }
  0xa6   : > { %403 = vadd.xlane.f32.xlu0 %v402_v41 }
 0x12f   : > { %v386_v42 = vpop.xlane.xlu0 %385 }
 0x130   : > { %v387_v43 = vrot.slane %v386_v42, 4 }
 0x132   : > { %v388_v44 = vadd.f32 %v387_v43, %v386_v42 }
 0x133   : > { %v404_v45 = vpop.xlane.xlu0 %403 }
 0x134   : > { %v389_v46 = vrot.slane %v388_v44, 2  ;;  %v405_v47 = vrot.slane %v404_v45, 4 }
 0x136   : > { %v406_v48 = vadd.f32 %v405_v47, %v404_v45  ;;  %v390_v49 = vadd.f32 %v389_v46, %v388_v44 }
 0x138   : > { %v407_v50 = vrot.slane %v406_v48, 2  ;;  %v391_v51 = vrot.slane %v390_v49, 1 }
 0x13a   : > { %v408_v52 = vadd.f32 %v407_v50, %v406_v48  ;;  %v392_v53 = vadd.f32 %v391_v51, %v390_v49 }
 0x13c   : > { %634 = vpush %v392_v53  ;;  %v409_v54 = vrot.slane %v408_v52, 1 }
 0x13e   : > { %v410_v55 = vadd.f32 %v409_v54, %v408_v52 }
 0x140   : > { %636 = vpush %v410_v55 }
 0x16d   : > { %s635_s19 = spop %634 }
 0x16e   : > { %v394_v61 = vstv %s635_s19  ;;  %s1013_s19 = smov [#allocation9]  }
 0x16f   : > { %v395_v62 = vmul.f32 %v626_v59, %v394_v61  ;;  %s835_s18 = sshll.u32 %s1013_s19, 4  ;;  %s836_s18 = int_to_ptr.vmem [resolvable:$false] %s835_s18 }
 0x170   : > { %s837_s2 = scalar_lea.vmem %s836_s18, 32  ;;  %p838_p10 = scmp.lt.s32.totalorder %s1308_s9, %s836_s18 }
 0x171   : > { %v396_v63 = vadd.f32 %v395_v62, %v380_v60  ;;  %s637_s3 = spop %636  ;;  %p839_p7 = scmp.lt.s32.totalorder %s837_s2, %s831_s30 }
 0x172   : > { %v412_v1 = vstv %s637_s3 }
 0x173   : > { %v413_v2 = vmul.f32 %v626_v59, %v412_v1  ;;  %398 = vst.msk [vmem:[%s1283_s4] sm:$0x1] %vm397_vm7, %v396_v63  ;;  %p840_p9 = por %p839_p7, %p838_p10 }
 0x175   : > { %p841_p8 = pnand %p840_p9, %p834_p6 }
 0x177   : > { %844 = shalt.err (!%p841_p8)
}
 0x178   : > { %s845_s4 = scalar_lea.hbm %s1306_s15, 16  ;;  %s849_s19 = scalar_lea.hbm %s1457_s6, 64 }
 0x179   : > { %p846_p12 = scmp.ne.s32.totalorder %s1306_s15, %s845_s4  ;;  %p850_p5 = scmp.lt.u32.totalorder %s1306_s15, %s1457_s6 }
 0x17a   : > { %p851_p11 = scmp.lt.u32.totalorder %s849_s19, %s845_s4  ;;  %p853_p1 = scmp.lt.u32.totalorder %s845_s4, %s1306_s15 }
 0x17b   : > { %p847_p0 = pnand %p846_p12, %p1458_p3 }
 0x17c   : > { %p852_p4 = por %p851_p11, %p850_p5 }
 0x17d   : > { %p848_p2 = pneg %p847_p0 }
 0x17e   : > { %p854_p13 = por %p853_p1, %p852_p4 }
 0x180   : > { %p855_p6 = pnand %p854_p13, %p848_p2 }
 0x182   : > { %858 = shalt.err (!%p855_p6)
}
 0x183   : > { %642 = dma.vmem_to_hbm [thread:$0]  (%p1458_p3), %s1308_s9, 16, %s1306_s15, %s417_s7   ;;  %v414_v3 = vadd.f32 %v413_v2, %v399_v0 }
 0x184   : > { %s1459_s2 = sld [smem:[#allocation22_spill]]  ;;  %s1460_s4 = sshll.u32 %s1286_s8, 4  ;;  %s1345_s4 = int_to_ptr.vmem [resolvable:$true] %s1460_s4 }
 0x185   : > { %415 = vst.msk [vmem:[%s1286_s8] sm:$0x1] %vm397_vm7, %v414_v3  ;;  %s421_s3 = scalar_lea.sflag [#allocation11], %s1273_s0  ;;  %s859_s19 = scalar_lea.vmem %s1345_s4, 16 }
 0x186   : > { %p860_p10 = scmp.ne.s32.totalorder %s1345_s4, %s859_s19  ;;  %s1014_s29 = smov [#allocation10]  }
 0x187   : > { %s863_s9 = sshll.u32 %s1014_s29, 4  ;;  %s864_s9 = int_to_ptr.vmem [resolvable:$false] %s863_s9 }
 0x188   : > { %p861_p7 = pnand %p860_p10, %p1458_p3  ;;  %s865_s15 = scalar_lea.vmem %s864_s9, 32 }
 0x189   : > { %p866_p8 = scmp.lt.s32.totalorder %s1345_s4, %s864_s9  ;;  %p867_p12 = scmp.lt.s32.totalorder %s865_s15, %s859_s19 }
 0x18a   : > { %s1341_s20 = scalar_lea.hbm %s1459_s2, %s628_s5  ;;  %p862_p9 = pneg %p861_p7 }
 0x18b   : > { %p868_p0 = por %p867_p12, %p866_p8 }
 0x18d   : > { %p869_p2 = pnand %p868_p0, %p862_p9 }
 0x18f   : > { %872 = shalt.err (!%p869_p2)
}
 0x190   : > { %s873_s0 = scalar_lea.hbm %s1341_s20, 16  ;;  %s877_s7 = scalar_lea.hbm %s1459_s2, 64 }
 0x191   : > { %p874_p5 = scmp.ne.s32.totalorder %s1341_s20, %s873_s0  ;;  %p878_p1 = scmp.lt.u32.totalorder %s1341_s20, %s1459_s2 }
 0x192   : > { %p879_p13 = scmp.lt.u32.totalorder %s877_s7, %s873_s0  ;;  %p881_p10 = scmp.lt.u32.totalorder %s873_s0, %s1341_s20 }
 0x193   : > { %p875_p11 = pnand %p874_p5, %p1458_p3 }
 0x194   : > { %p880_p6 = por %p879_p13, %p878_p1 }
 0x195   : > { %p876_p4 = pneg %p875_p11 }
 0x196   : > { %p882_p7 = por %p881_p10, %p880_p6 }
 0x198   : > { %p883_p9 = pnand %p882_p7, %p876_p4 }
 0x19a   : > { %886 = shalt.err (!%p883_p9)
}
 0x19b   : > { %643 = dma.vmem_to_hbm [thread:$0]  (%p1458_p3), %s1345_s4, 16, %s1341_s20, %s421_s3  }
 0x19c PF: > { %p661_p8 = scmp.ge.s32.totalorder %s1005_s24, 2  ;;  %s462_s30 = sand.u32 1, %s957_s12  }
 0x19d   : > { %p1461_p12 = scmp.ne.s32.totalorder %s1449_s11, 0  ;;  %s463_s19 = scalar_lea.sflag [#allocation6], %s462_s30 }
 0x19f   : > { %p654_p0 = pnand %p661_p8, %p1461_p12 }
 0x1a1   : > { %948 = dma.done.wait (!%p654_p0), %s463_s19, 16  }
 0x1a2   : > { %950 = vsyncadd (!%p654_p0), %s463_s19, 4294967280  ;;  %s471_s29 = scalar_lea.sflag [#allocation11], %s462_s30 }
 0x1a3   : > { %952 = dma.done.wait (!%p654_p0), %s471_s29, 16  }
 0x1a4   : > { %954 = vsyncadd (!%p654_p0), %s471_s29, 4294967280  ;;  %s26_s24 = sadd.s32 1, %s1005_s24   ;;  %s1463_s11 = sld [smem:[#allocation18_spill]] }
 0x1a5   : > { %p1376_p2 = scmp.ge.s32.totalorder %s26_s24, 14   ;;  %s1464_s4 = sld [smem:[#allocation19_spill]] }
 0x1a6   : > { %s1465_s12 = smov %s961_s13  ;;  %s1466_s13 = smov %s965_s14 }
 0x1a7   : > { %s1467_s14 = smov %s1202_s28  ;;  %s1468_s15 = smov %s973_s16 }
 0x1a8   : > { %s1469_s16 = smov %s977_s17  ;;  %s1470_s17 = smov %s1132_s10 }
 0x1a9   : > { %s1471_s18 = smov %s993_s21  ;;  %s1472_s19 = smov %s997_s22 }
 0x1aa   : > { %s1473_s20 = smov %s1001_s23  ;;  %s1474_s21 = smov %s1463_s11 }
 0x1ab   : > { %s1475_s22 = smov %s1480_s26  ;;  %s1476_s23 = smov %s1464_s4 }
 0x1ac   :  { %25 = sbr.rel (!%p1376_p2) target bundleno = 18 (0x12), region = 125 }
 0x1b3   :  { %475 = vsyncpa [#allocation5], 1 }
 0x1b4   :  { %477 = vsyncpa [#allocation5 + $0x1], 1 }
 0x1b5   :  { %478 = vsyncpa [#allocation8], 1 }
 0x1b6   :  { %480 = vsyncpa [#allocation8 + $0x1], 1 }
 0x1b7   :  { %481 = vsyncpa [#allocation6], 1 }
 0x1b8   :  { %483 = vsyncpa [#allocation6 + $0x1], 1 }
 0x1b9   :  { %484 = vsyncpa [#allocation11], 1 }
 0x1ba   :  { %486 = vsyncpa [#allocation11 + $0x1], 1 }

</bundles_post_ra>
